<compile_context>
chip_gen: v7x
topology: tpu7x:2x2x1
jax: 0.10.0
libtpu: 0.0.40
codegen_flags: <defaults>
</compile_context>

<pallas_src>
import jax
import jax.numpy as jnp
from jax.experimental import pallas as pl


def bam_kernel(x_ref, wred_ref, wlin_ref, bias_ref, ws_ref, out_ref):
    """Whole-batch BAM forward.

    x_ref    : (B*C, HW)  input, batch and channel dims flattened together
    wred_ref : (2B, B*C)  block-diagonal packing of the two 1x1-conv weights
    wlin_ref : (HW, 2F)   [wq_lin | wk_lin] (Linear weights, pre-transposed)
    bias_ref : (1, 2F)    [bq_eff | bk_eff] (conv bias folded into linear bias)
    ws_ref   : (1, C)     s_conv 1x1 weight (bias dropped: softmax-invariant)
    out_ref  : (B, C, F, F)
    """
    B, C, F, _ = out_ref.shape

    # Both 1x1 convs (channel reduction), all batch elements, one MXU dot.
    qkc = jnp.dot(wred_ref[...], x_ref[...],
                  preferred_element_type=jnp.float32)                  # (2B, HW)

    # Both Linear projections (+ folded biases), one MXU dot.
    qk = jnp.dot(qkc, wlin_ref[...],
                 preferred_element_type=jnp.float32) + bias_ref[...]   # (2B, 2F)

    q = qk[0:B, 0:F]          # (B, F)  rows 0..B-1  -> query path, cols 0..F-1
    k = qk[B:2 * B, F:2 * F]  # (B, F)  rows B..2B-1 -> key path,   cols F..2F-1

    # Bilinear attention map: per-batch outer product q k^T.
    att = q[:, :, None] * k[:, None, :]                                # (B, F, F)

    # s_conv (1 -> C channels) without bias: per-channel scale.
    ws = ws_ref[...]                                                   # (1, C)
    s = att[:, None, :, :] * ws[0][None, :, None, None]                # (B, C, F, F)

    # Softmax over the last axis (dim=-1 in PyTorch).
    m = jnp.max(s, axis=-1, keepdims=True)
    e = jnp.exp(s - m)
    d = jnp.sum(e, axis=-1, keepdims=True)
    out_ref[...] = e * pl.reciprocal(d, approx=True)


def bam_forward(x, params):
    """x: (B, C, H, W) float32.  Returns (B, C, F, F)."""
    B, C, H, W = x.shape
    HW = H * W
    F = params["wq_lin"].shape[1]

    x2d = x.reshape(B * C, HW)

    # Fold the 1x1-conv biases into the Linear biases (exact):
    #   (qc + b_conv) @ W_lin + b_lin == qc @ W_lin + (b_conv * sum_n W_lin + b_lin)
    b_q = params["bq_conv"][0, 0] * jnp.sum(params["wq_lin"], axis=0) + params["bq_lin"][0]
    b_k = params["bk_conv"][0, 0] * jnp.sum(params["wk_lin"], axis=0) + params["bk_lin"][0]
    b_cat = jnp.concatenate([b_q, b_k])[None, :]                              # (1, 2F)

    # Fuse the query/key Linear weights.
    w_lin_cat = jnp.concatenate([params["wq_lin"], params["wk_lin"]], axis=1)  # (HW, 2F)

    # Block-diagonal packing of the 1x1-conv weights so the per-batch channel
    # reduction for both q and k becomes a single (2B, B*C) @ (B*C, HW) dot.
    eye_b = jnp.eye(B, dtype=x.dtype)
    w_red = jnp.concatenate(
        [jnp.kron(eye_b, params["wq_conv"]),     # (B, B*C)
         jnp.kron(eye_b, params["wk_conv"])],    # (B, B*C)
        axis=0)                                  # (2B, B*C)

    # s_conv bias is dropped: constant along the softmax axis, cancels exactly.

    return pl.pallas_call(
        bam_kernel,
        out_shape=jax.ShapeDtypeStruct((B, C, F, F), jnp.float32),
    )(x2d, w_red, w_lin_cat, b_cat, params["ws"])


def init_params(key, in_dim, in_feature, out_feature):
    ks = jax.random.split(key, 10)
    scale = 0.1
    p = {
        # Conv2d(in_dim, 1, 1): weight (1, in_dim, 1, 1) -> stored as (1, C)
        "wq_conv": scale * jax.random.normal(ks[0], (1, in_dim), jnp.float32),
        "bq_conv": scale * jax.random.normal(ks[1], (1, 1), jnp.float32),
        "wk_conv": scale * jax.random.normal(ks[2], (1, in_dim), jnp.float32),
        "bk_conv": scale * jax.random.normal(ks[3], (1, 1), jnp.float32),
        # Linear(in_feature, out_feature): weight (out, in) -> stored transposed (in, out)
        "wq_lin": scale * jax.random.normal(ks[4], (in_feature, out_feature), jnp.float32),
        "bq_lin": scale * jax.random.normal(ks[5], (1, out_feature), jnp.float32),
        "wk_lin": scale * jax.random.normal(ks[6], (in_feature, out_feature), jnp.float32),
        "bk_lin": scale * jax.random.normal(ks[7], (1, out_feature), jnp.float32),
        # Conv2d(1, in_dim, 1): weight (in_dim, 1, 1, 1) -> stored as (1, in_dim)
        "ws": scale * jax.random.normal(ks[8], (1, in_dim), jnp.float32),
        "bs": scale * jax.random.normal(ks[9], (1, in_dim), jnp.float32),
    }
    return p


def bam_reference(x, p):
    """Pure-JAX reference mirroring the PyTorch forward exactly (unfolded biases)."""
    B, C, H, W = x.shape
    x_flat = x.reshape(B, C, H * W)
    qc = jnp.einsum("c,bcn->bn", p["wq_conv"][0], x_flat) + p["bq_conv"][0, 0]
    kc = jnp.einsum("c,bcn->bn", p["wk_conv"][0], x_flat) + p["bk_conv"][0, 0]
    q = qc @ p["wq_lin"] + p["bq_lin"][0]      # (B, F)
    k = kc @ p["wk_lin"] + p["bk_lin"][0]      # (B, F)
    att = q[:, :, None] * k[:, None, :]        # (B, F, F)
    s = p["ws"][0][None, :, None, None] * att[:, None, :, :] \
        + p["bs"][0][None, :, None, None]      # (B, C, F, F)
    return jax.nn.softmax(s, axis=-1)


if __name__ == "__main__":
    B, C, H, W = 2, 4, 16, 16
    in_feature = H * W       # 256
    out_feature = 32

    key = jax.random.PRNGKey(0)
    kx, kp = jax.random.split(key)
    x = jax.random.normal(kx, (B, C, H, W), jnp.float32)
    params = init_params(kp, C, in_feature, out_feature)

    out = bam_forward(x, params)
    out = jax.block_until_ready(out)

    ref = bam_reference(x, params)
    assert out.shape == (B, C, out_feature, out_feature)
    # Tolerance relaxed slightly because of pl.reciprocal(approx=True) in the
    # softmax denominator; the bias folding / bs-drop are mathematically exact.
    assert jnp.allclose(out, ref, atol=5e-3, rtol=5e-3), "mismatch vs reference"

    print("KERNEL_OK")
</pallas_src>

<mosaic_0001>
module attributes {stable_mosaic.version = 11 : i64} {
  func.func @bam_kernel(%arg0: memref<8x256xf32, #tpu.memory_space<vmem>>, %arg1: memref<4x8xf32, #tpu.memory_space<vmem>>, %arg2: memref<256x64xf32, #tpu.memory_space<vmem>>, %arg3: memref<1x64xf32, #tpu.memory_space<vmem>>, %arg4: memref<1x4xf32, #tpu.memory_space<vmem>>, %arg5: memref<2x4x32x32xf32, #tpu.memory_space<vmem>>) attributes {dimension_semantics = [], scalar_prefetch = 0 : i64, scratch_operands = 0 : i64, tpu.core_type = #tpu.core_type<tc>} {
    %c0 = arith.constant 0 : index
    %c0_0 = arith.constant 0 : index
    %0 = vector.load %arg1[%c0, %c0_0] : memref<4x8xf32, #tpu.memory_space<vmem>>, vector<4x8xf32>
    %c0_1 = arith.constant 0 : index
    %c0_2 = arith.constant 0 : index
    %1 = vector.load %arg0[%c0_1, %c0_2] : memref<8x256xf32, #tpu.memory_space<vmem>>, vector<8x256xf32>
    %cst = arith.constant dense<0.000000e+00> : vector<4x256xf32>
    %2 = tpu.matmul %0, %1, %cst {dimension_numbers = #tpu.dot_dimension_numbers<[1], [0], [0], [1], [0, 0, 1, 1], [], []>} : vector<4x8xf32>, vector<8x256xf32>, vector<4x256xf32> -> vector<4x256xf32>
    %c0_3 = arith.constant 0 : index
    %c0_4 = arith.constant 0 : index
    %3 = vector.load %arg2[%c0_3, %c0_4] : memref<256x64xf32, #tpu.memory_space<vmem>>, vector<256x64xf32>
    %cst_5 = arith.constant dense<0.000000e+00> : vector<4x64xf32>
    %4 = tpu.matmul %2, %3, %cst_5 {dimension_numbers = #tpu.dot_dimension_numbers<[1], [0], [0], [1], [0, 0, 1, 1], [], []>} : vector<4x256xf32>, vector<256x64xf32>, vector<4x64xf32> -> vector<4x64xf32>
    %c0_6 = arith.constant 0 : index
    %c0_7 = arith.constant 0 : index
    %5 = vector.load %arg3[%c0_6, %c0_7] : memref<1x64xf32, #tpu.memory_space<vmem>>, vector<1x64xf32>
    %6 = vector.broadcast %5 : vector<1x64xf32> to vector<4x64xf32>
    %7 = arith.addf %4, %6 : vector<4x64xf32>
    %8 = vector.extract_strided_slice %7 {offsets = [0, 0], sizes = [2, 32], strides = [1, 1]} : vector<4x64xf32> to vector<2x32xf32>
    %9 = vector.extract_strided_slice %7 {offsets = [2, 32], sizes = [2, 32], strides = [1, 1]} : vector<4x64xf32> to vector<2x32xf32>
    %10 = vector.shape_cast %8 : vector<2x32xf32> to vector<2x32x1xf32>
    %11 = vector.shape_cast %9 : vector<2x32xf32> to vector<2x1x32xf32>
    %12 = vector.broadcast %10 : vector<2x32x1xf32> to vector<2x32x32xf32>
    %13 = vector.broadcast %11 : vector<2x1x32xf32> to vector<2x32x32xf32>
    %14 = arith.mulf %12, %13 : vector<2x32x32xf32>
    %c0_8 = arith.constant 0 : index
    %c0_9 = arith.constant 0 : index
    %15 = vector.load %arg4[%c0_8, %c0_9] : memref<1x4xf32, #tpu.memory_space<vmem>>, vector<1x4xf32>
    %16 = vector.shape_cast %14 : vector<2x32x32xf32> to vector<2x1x32x32xf32>
    %17 = vector.shape_cast %15 : vector<1x4xf32> to vector<4xf32>
    %18 = vector.shape_cast %17 : vector<4xf32> to vector<1x4x1x1xf32>
    %19 = vector.broadcast %16 : vector<2x1x32x32xf32> to vector<2x4x32x32xf32>
    %20 = vector.broadcast %18 : vector<1x4x1x1xf32> to vector<2x4x32x32xf32>
    %21 = arith.mulf %19, %20 : vector<2x4x32x32xf32>
    %cst_10 = arith.constant dense<0xFF800000> : vector<2x4x32xf32>
    %22 = vector.multi_reduction <maximumf>, %21, %cst_10 [3] : vector<2x4x32x32xf32> to vector<2x4x32xf32>
    %23 = vector.shape_cast %22 : vector<2x4x32xf32> to vector<2x4x32x1xf32>
    %24 = vector.broadcast %23 : vector<2x4x32x1xf32> to vector<2x4x32x32xf32>
    %25 = arith.subf %21, %24 : vector<2x4x32x32xf32>
    %26 = math.exp %25 : vector<2x4x32x32xf32>
    %cst_11 = arith.constant dense<0.000000e+00> : vector<2x4x32xf32>
    %27 = vector.multi_reduction <add>, %26, %cst_11 [3] : vector<2x4x32x32xf32> to vector<2x4x32xf32>
    %28 = vector.shape_cast %27 : vector<2x4x32xf32> to vector<2x4x32x1xf32>
    %29 = tpu.reciprocal %28 {approx = true} : vector<2x4x32x1xf32> -> vector<2x4x32x1xf32>
    %30 = vector.broadcast %29 : vector<2x4x32x1xf32> to vector<2x4x32x32xf32>
    %31 = arith.mulf %26, %30 : vector<2x4x32x32xf32>
    %c0_12 = arith.constant 0 : index
    %c0_13 = arith.constant 0 : index
    %c0_14 = arith.constant 0 : index
    %c0_15 = arith.constant 0 : index
    %32 = vector.load %arg5[%c0_12, %c0_13, %c0_14, %c0_15] : memref<2x4x32x32xf32, #tpu.memory_space<vmem>>, vector<2x4x32x32xf32>
    tpu.vector_store %arg5[%c0_12, %c0_13, %c0_14, %c0_15], %31 {strides = array<i32>} : memref<2x4x32x32xf32, #tpu.memory_space<vmem>>, vector<2x4x32x32xf32>,
    return
  }
}

</mosaic_0001>

<bundles_post_ra>
// kernel: tpu_custom_call.1
= control target key start
LH: loop header
LB: loop body
LE: loop exit
PB: predicated region body
PF: predicated region fallthrough
CT: control target
= control target key end

     0   :  { %vm24_vm0 = vcmask 64512   ;;  %v1231_v3 = vmov 0.0   ;;  %s1806_s0 = inlined_call_operand.vmem [shape: f32[8,256], index: 0, kind: input, shape index: {}]   ;;  %s1807_s1 = inlined_call_operand.vmem [shape: f32[4,8], index: 1, kind: input, shape index: {}]   ;;  %s1808_s2 = inlined_call_operand.vmem [shape: f32[256,64], index: 2, kind: input, shape index: {}]   ;;  %s1809_s3 = inlined_call_operand.vmem [shape: f32[1,64], index: 3, kind: input, shape index: {}]   ;;  %s1810_s4 = inlined_call_operand.vmem [shape: f32[1,4], index: 4, kind: input, shape index: {}]   ;;  %s1811_s5 = inlined_call_operand.hbm [shape: f32[2,4,32,32], index: 5, kind: output, shape index: {}]  }
   0x1   :  { %v23_v0 = vld [vmem:[%s1806_s0 + $0x8] sm:$0xff]  ;;  %v22_v1 = vld [vmem:[%s1806_s0] sm:$0xff]  ;;  %92 = vmatprep.mubr.f32.mxu0 %v1231_v3  ;;  %v117_v9 = vld [vmem:[%s1808_s2 + $0x90] sm:$0xff] }
   0x2   :  { %v21_v2 = vld [vmem:[%s1807_s1] sm:$0xf]  ;;  %28 = vmatprep.subr.mxu0 %v23_v0  ;;  %v116_v5 = vld [vmem:[%s1808_s2 + $0x88] sm:$0xff]  ;;  %v118_v10 = vld [vmem:[%s1808_s2 + $0x98] sm:$0xff] }
   0x3   :  { %v115_v4 = vld [vmem:[%s1808_s2 + $0x80] sm:$0xff]  ;;  %29 = vmatpush1.msra.mxu0 %v22_v1  ;;  %v100_v8 = vld [vmem:[%s1808_s2 + $0x8] sm:$0xff]  ;;  %v1045_v12 = vpack.c.bf16 %v118_v10, %v117_v9  ;;  %v101_v13 = vld [vmem:[%s1808_s2 + $0x10] sm:$0xff] }
   0x4   :  { %v99_v6 = vld [vmem:[%s1808_s2] sm:$0xff]  ;;  %v1041_v7 = vpack.c.bf16 %v116_v5, %v115_v4  ;;  %1003 = vmatmul.mubr.msk.f32.vlgmr.msra.gmra.mrb[0].mxu0 %vm24_vm0, %v21_v2  ;;  %v102_v14 = vld [vmem:[%s1808_s2 + $0x18] sm:$0xff]  ;;  %v120_v16 = vld [vmem:[%s1808_s2 + $0xa8] sm:$0xff] }
   0x5   :  { %v1043_v11 = vpack.c.bf16 %v100_v8, %v99_v6  ;;  %v119_v15 = vld [vmem:[%s1808_s2 + $0xa0] sm:$0xff]  ;;  %v1047_v17 = vpack.c.bf16 %v102_v14, %v101_v13  ;;  %v104_v20 = vld [vmem:[%s1808_s2 + $0x28] sm:$0xff]  ;;  %v121_v21 = vld [vmem:[%s1808_s2 + $0xb0] sm:$0xff] }
   0x6   :  { %1042 = vmatprep.subr.bf16.mxu1 %v1041_v7  ;;  %v1049_v18 = vpack.c.bf16 %v120_v16, %v119_v15  ;;  %v103_v19 = vld [vmem:[%s1808_s2 + $0x20] sm:$0xff]  ;;  %v122_v22 = vld [vmem:[%s1808_s2 + $0xb8] sm:$0xff]  ;;  %v105_v25 = vld [vmem:[%s1808_s2 + $0x30] sm:$0xff] }
   0x7   :  { %1044 = vmatpush3.bf16.msra.mxu1 %v1043_v11  ;;  %v1051_v23 = vpack.c.bf16 %v104_v20, %v103_v19  ;;  %v1053_v24 = vpack.c.bf16 %v122_v22, %v121_v21  ;;  %v106_v26 = vld [vmem:[%s1808_s2 + $0x38] sm:$0xff]  ;;  %v123_v27 = vld [vmem:[%s1808_s2 + $0xc0] sm:$0xff]  ;;  %v124_v28 = vld [vmem:[%s1808_s2 + $0xc8] sm:$0xff] }
   0x8   :  { %1046 = vmatprep.subr.bf16.mxu1 %v1045_v12 }
   0xb   :  { %1048 = vmatpush3.bf16.msra.mxu1 %v1047_v17 }
   0xc   :  { %1050 = vmatprep.subr.bf16.mxu1 %v1049_v18 }
   0xd   :  { %10 = vsyncpa [#allocation3], 0  ;;  %v1055_v29 = vpack.c.bf16 %v106_v26, %v105_v25  ;;  %v1057_v30 = vpack.c.bf16 %v124_v28, %v123_v27  ;;  %v107_v31 = vld [vmem:[%s1808_s2 + $0x40] sm:$0xff]  ;;  %v108_v32 = vld [vmem:[%s1808_s2 + $0x48] sm:$0xff]  ;;  %v208_v55 = vlaneseq  ;;  %v1232_v56 = vmov 1966171168  }
   0xe   :  { %v125_v33 = vld [vmem:[%s1808_s2 + $0xd0] sm:$0xff]  ;;  %v126_v34 = vld [vmem:[%s1808_s2 + $0xd8] sm:$0xff]  ;;  %v1059_v35 = vpack.c.bf16 %v108_v32, %v107_v31  ;;  %v127_v39 = vld [vmem:[%s1808_s2 + $0xe0] sm:$0xff]  ;;  %v248_v57 = vunpack.c.l.s4 %v1232_v56  ;;  %vm345_vm1 = vcmask 523520   ;;  %vm666_vm2 = vcmask 261120  }
   0xf   :  { %1052 = vmatpush3.bf16.msra.mxu1 %v1051_v23  ;;  %v1061_v36 = vpack.c.bf16 %v126_v34, %v125_v33  ;;  %v109_v37 = vld [vmem:[%s1808_s2 + $0x50] sm:$0xff]  ;;  %v110_v38 = vld [vmem:[%s1808_s2 + $0x58] sm:$0xff]  ;;  %v128_v40 = vld [vmem:[%s1808_s2 + $0xe8] sm:$0xff]  ;;  %v209_v58 = vshrl.u32 %v208_v55, 7 }
  0x10   :  { %1054 = vmatprep.subr.bf16.mxu1 %v1053_v24  ;;  %v1063_v41 = vpack.c.bf16 %v110_v38, %v109_v37  ;;  %v1065_v42 = vpack.c.bf16 %v128_v40, %v127_v39  ;;  %v111_v43 = vld [vmem:[%s1808_s2 + $0x60] sm:$0xff]  ;;  %v112_v44 = vld [vmem:[%s1808_s2 + $0x68] sm:$0xff]  ;;  %v129_v45 = vld [vmem:[%s1808_s2 + $0xf0] sm:$0xff]  ;;  %v249_v59 = vunpack.c.0.s8 %v248_v57 }
  0x11   :  { %v130_v46 = vld [vmem:[%s1808_s2 + $0xf8] sm:$0xff]  ;;  %v1067_v47 = vpack.c.bf16 %v112_v44, %v111_v43  ;;  %v113_v49 = vld [vmem:[%s1808_s2 + $0x70] sm:$0xff]  ;;  %v1005_v54 = vld [vmem:[%s1810_s4] ss:$0 sm:$0xff]  ;;  %v210_v0 = vsub.s32 0, %v209_v58  ;;  %v229_v7 = vsub.s32 1, %v209_v58 }
  0x12   :  { %v1069_v48 = vpack.c.bf16 %v130_v46, %v129_v45  ;;  %v114_v50 = vld [vmem:[%s1808_s2 + $0x78] sm:$0xff]  ;;  %295 = vbcast.lane.b32.xlu0 %v1005_v54, 256  ;;  %v1004_v61 = vld [vmem:[%s1809_s3] ss:$0 sm:$0xff]  ;;  %v252_v1 = vsub.s32 %v249_v59, %v209_v58  ;;  %v307_v15 = vsub.s32 2, %v209_v58  ;;  %v311_v16 = vsub.s32 3, %v209_v58 }
  0x13   :  { %1056 = vmatpush3.bf16.msra.mxu1 %v1055_v29  ;;  %v1071_v51 = vpack.c.bf16 %v114_v50, %v113_v49  ;;  %s1233_s2 = smov 96   ;;  %s1234_s3 = smov [#allocation2]  }
  0x14   :  { %1058 = vmatprep.subr.bf16.mxu1 %v1057_v30  ;;  %s992_s4 = sshll.u32 %s1234_s3, 4  ;;  %s993_s4 = int_to_ptr.vmem [resolvable:$true] %s992_s4 }
  0x15   :  { %s1207_s11 = scalar_lea.vmem %s993_s4, 4096  ;;  %p1212_p1 = scmp.lt.s32.totalorder %s993_s4, %s993_s4 }
  0x16   :  { %p1208_p0 = scmp.ne.s32.totalorder %s993_s4, %s1207_s11  ;;  %p1213_p2 = scmp.lt.s32.totalorder %s1207_s11, %s1207_s11 }
  0x17   :  { %1060 = vmatpush3.bf16.msra.mxu1 %v1059_v35 }
  0x18   :  { %1062 = vmatprep.subr.bf16.mxu1 %v1061_v36  ;;  %p1214_p3 = por %p1213_p2, %p1212_p1 }
  0x1a   :  { %p1215_p4 = pnand %p1214_p3, %p1208_p0 }
  0x1b   :  { %1064 = vmatpush3.bf16.msra.mxu1 %v1063_v41 }
  0x1c   :  { %1066 = vmatprep.subr.bf16.mxu1 %v1065_v42 }
  0x1f   :  { %1068 = vmatpush3.bf16.msra.mxu1 %v1067_v47 }
  0x20   :  { %1070 = vmatprep.subr.bf16.mxu1 %v1069_v48 }
  0x23   :  { %1072 = vmatpush3.bf16.msra.mxu1 %v1071_v51 }
  0x84   :  { %v296_v14 = vpop.permute.xlu0 %295 }
  0x85   :  { %v300_v19 = vrot.slane %v296_v14, %v210_v0  ;;  %v304_v20 = vrot.slane %v296_v14, %v229_v7  ;;  %v308_v23 = vrot.slane %v296_v14, %v307_v15  ;;  %v312_v24 = vrot.slane %v296_v14, %v311_v16 }
  0xd7   :  { %v94_v52 = vpop.f32.mrb[0].mxu0 }
  0xd8   :  { %v96_v53 = vpop.f32.mrb[1].mxu0 }
  0xd9   :  { %202 = vmatprep.mubr.f32.mxu1 %v96_v53 }
  0xda   :  { %203 = vmatmul.mubr.f32.vlgmr.msra.gmra.mrb[0].mxu1 %v94_v52 }
 0x1ad   :  { %v1038_v60 = vpop.f32.mrb[0].mxu1 }
 0x1ae   :  { %v1039_v62 = vpop.f32.mrb[1].mxu1 }
 0x1af   :  { %v1040_v63 = vadd.f32 %v1039_v62, %v1038_v60 }
 0x1b1   :  { %v205_v2 = vadd.f32 %v1040_v63, %v1004_v61 }
 0x1b3   :  { %v211_v3 = vrot.slane %v205_v2, %v210_v0  ;;  %v253_v4 = vrot.slane %v205_v2, %v252_v1  ;;  %v230_v12 = vrot.slane %v205_v2, %v229_v7 }
 0x1b5   :  { %v254_v5 = vcombine.high %v253_v4, %v253_v4  ;;  %v261_v6 = vrot.slane %v253_v4, %v252_v1  ;;  %221 = vbcast.lane.b32.xlu1 %v211_v3, 272  ;;  %213 = vbcast.lane.b32.xlu0 %v211_v3, 256 }
 0x1b7   :  { %v268_v8 = vrot.slane %v254_v5, %v252_v1  ;;  %v269_v9 = vcombine.high %v261_v6, %v261_v6 }
 0x1b9   :  { %v270_v10 = vcombine.high %v268_v8, %v268_v8  ;;  %225 = vbcast.lane.b32.xlu1 %v211_v3, 280  ;;  %217 = vbcast.lane.b32.xlu0 %v211_v3, 264  ;;  %v274_v11 = vrot.slane %v269_v9, %v210_v0 }
 0x1bb   :  { %v278_v13 = vrot.slane %v270_v10, %v210_v0 }
 0x1bd   :  { %236 = vbcast.lane.b32.xlu1 %v230_v12, 264  ;;  %232 = vbcast.lane.b32.xlu0 %v230_v12, 256 }
 0x1c1   :  { %244 = vbcast.lane.b32.xlu1 %v230_v12, 280  ;;  %240 = vbcast.lane.b32.xlu0 %v230_v12, 272 }
 0x227   :  { %v222_v17 = vpop.permute.xlu1 %221  ;;  %v214_v18 = vpop.permute.xlu0 %213 }
 0x228   :  { %v283_v21 = vmul.f32 %v274_v11, %v222_v17  ;;  %v281_v22 = vmul.f32 %v274_v11, %v214_v18 }
 0x22a   :  { %v1378_v25 = vmul.f32 %v300_v19, %v281_v22  ;;  %v1380_v26 = vmul.f32 %v300_v19, %v283_v21  ;;  %v1382_v27 = vmul.f32 %v304_v20, %v281_v22  ;;  %v1384_v28 = vmul.f32 %v304_v20, %v283_v21 }
 0x22b   :  { %v226_v29 = vpop.permute.xlu1 %225  ;;  %v218_v30 = vpop.permute.xlu0 %217  ;;  %v1386_v31 = vmul.f32 %v308_v23, %v281_v22  ;;  %v1388_v32 = vmul.f32 %v308_v23, %v283_v21  ;;  %v1390_v33 = vmul.f32 %v312_v24, %v281_v22  ;;  %v1392_v34 = vmul.f32 %v312_v24, %v283_v21 }
 0x22c   :  { %v284_v35 = vmul.f32 %v274_v11, %v226_v29  ;;  %v282_v36 = vmul.f32 %v274_v11, %v218_v30  ;;  %v346_v37 = vsel %vm345_vm1, %v1378_v25, -inf  ;;  %v352_v55 = vsel %vm345_vm1, %v1380_v26, -inf }
 0x22d   :  { %347 = vmax.xlane.f32.xlu1 %v346_v37  ;;  %v358_v7 = vsel %vm345_vm1, %v1382_v27, -inf  ;;  %v370_v15 = vsel %vm345_vm1, %v1386_v31, -inf  ;;  %v376_v17 = vsel %vm345_vm1, %v1388_v32, -inf  ;;  %v388_v21 = vsel %vm345_vm1, %v1392_v34, -inf }
 0x22e   :  { %v1396_v38 = vmul.f32 %v300_v19, %v284_v35  ;;  %v1398_v39 = vmul.f32 %v300_v19, %v282_v36  ;;  %v1400_v40 = vmul.f32 %v304_v20, %v282_v36  ;;  %v1402_v41 = vmul.f32 %v304_v20, %v284_v35 }
 0x22f   :  { %v237_v42 = vpop.permute.xlu1 %236  ;;  %v233_v43 = vpop.permute.xlu0 %232  ;;  %v1404_v44 = vmul.f32 %v308_v23, %v282_v36  ;;  %v1406_v45 = vmul.f32 %v308_v23, %v284_v35  ;;  %v1408_v46 = vmul.f32 %v312_v24, %v282_v36  ;;  %v1410_v47 = vmul.f32 %v312_v24, %v284_v35 }
 0x230   :  { %v286_v48 = vmul.f32 %v278_v13, %v237_v42  ;;  %v285_v49 = vmul.f32 %v278_v13, %v233_v43  ;;  %v355_v50 = vsel %vm345_vm1, %v1396_v38, -inf  ;;  %v349_v51 = vsel %vm345_vm1, %v1398_v39, -inf }
 0x231   :  { %356 = vmax.xlane.f32.xlu1 %v355_v50  ;;  %350 = vmax.xlane.f32.xlu0 %v349_v51  ;;  %v361_v61 = vsel %vm345_vm1, %v1400_v40, -inf  ;;  %v367_v6 = vsel %vm345_vm1, %v1402_v41, -inf  ;;  %v373_v12 = vsel %vm345_vm1, %v1404_v44, -inf  ;;  %v379_v14 = vsel %vm345_vm1, %v1406_v45, -inf }
 0x232   :  { %v1416_v52 = vmul.f32 %v300_v19, %v286_v48  ;;  %v1420_v56 = vmul.f32 %v300_v19, %v285_v49  ;;  %v1422_v57 = vmul.f32 %v304_v20, %v286_v48  ;;  %v1424_v58 = vmul.f32 %v304_v20, %v285_v49 }
 0x233   :  { %v245_v53 = vpop.permute.xlu1 %244  ;;  %v241_v54 = vpop.permute.xlu0 %240  ;;  %v1428_v62 = vmul.f32 %v308_v23, %v286_v48  ;;  %v1430_v63 = vmul.f32 %v308_v23, %v285_v49  ;;  %v1442_v5 = vmul.f32 %v312_v24, %v286_v48  ;;  %v1452_v10 = vmul.f32 %v312_v24, %v285_v49 }
 0x234   :  { %v288_v59 = vmul.f32 %v278_v13, %v245_v53  ;;  %v287_v60 = vmul.f32 %v278_v13, %v241_v54  ;;  %v364_v13 = vsel %vm345_vm1, %v1384_v28, -inf  ;;  %v385_v16 = vsel %vm345_vm1, %v1408_v46, -inf }
 0x235   :  { %362 = vmax.xlane.f32.xlu1 %v361_v61  ;;  %353 = vmax.xlane.f32.xlu0 %v352_v55  ;;  %v391_v18 = vsel %vm345_vm1, %v1410_v47, -inf  ;;  %v406_v35 = vsel %vm345_vm1, %v1424_v58, -inf  ;;  %v421_v36 = vsel %vm345_vm1, %v1428_v62, -inf  ;;  %v418_v43 = vsel %vm345_vm1, %v1430_v63, -inf }
 0x236   :  { %v1432_v0 = vmul.f32 %v300_v19, %v288_v59  ;;  %v1434_v1 = vmul.f32 %v300_v19, %v287_v60  ;;  %v1436_v2 = vmul.f32 %v304_v20, %v288_v59  ;;  %v1438_v3 = vmul.f32 %v304_v20, %v287_v60 }
 0x237   :  { %v1440_v4 = vmul.f32 %v308_v23, %v288_v59  ;;  %v1448_v8 = vmul.f32 %v308_v23, %v287_v60  ;;  %v1450_v9 = vmul.f32 %v312_v24, %v288_v59  ;;  %v1454_v11 = vmul.f32 %v312_v24, %v287_v60 }
 0x238   :  { %v382_v19 = vsel %vm345_vm1, %v1390_v33, -inf  ;;  %v397_v20 = vsel %vm345_vm1, %v1416_v52, -inf  ;;  %v403_v22 = vsel %vm345_vm1, %v1432_v0, -inf  ;;  %v394_v23 = vsel %vm345_vm1, %v1420_v56, -inf }
 0x239   :  { %368 = vmax.xlane.f32.xlu1 %v367_v6  ;;  %359 = vmax.xlane.f32.xlu0 %v358_v7  ;;  %v409_v24 = vsel %vm345_vm1, %v1422_v57, -inf  ;;  %v400_v29 = vsel %vm345_vm1, %v1434_v1, -inf  ;;  %v415_v30 = vsel %vm345_vm1, %v1436_v2, -inf  ;;  %v412_v37 = vsel %vm345_vm1, %v1438_v3, -inf }
 0x23a   :  { %v427_v42 = vsel %vm345_vm1, %v1440_v4, -inf  ;;  %v433_v48 = vsel %vm345_vm1, %v1442_v5, -inf  ;;  %v424_v49 = vsel %vm345_vm1, %v1448_v8, -inf  ;;  %v439_v50 = vsel %vm345_vm1, %v1450_v9, -inf }
 0x23b   :  { %v430_v51 = vsel %vm345_vm1, %v1452_v10, -inf  ;;  %v436_v53 = vsel %vm345_vm1, %v1454_v11, -inf }
 0x23d   :  { %374 = vmax.xlane.f32.xlu1 %v373_v12  ;;  %365 = vmax.xlane.f32.xlu0 %v364_v13 }
 0x241   :  { %380 = vmax.xlane.f32.xlu1 %v379_v14  ;;  %371 = vmax.xlane.f32.xlu0 %v370_v15 }
 0x245   :  { %386 = vmax.xlane.f32.xlu1 %v385_v16  ;;  %377 = vmax.xlane.f32.xlu0 %v376_v17 }
 0x249   :  { %392 = vmax.xlane.f32.xlu1 %v391_v18  ;;  %383 = vmax.xlane.f32.xlu0 %v382_v19 }
 0x24d   :  { %398 = vmax.xlane.f32.xlu1 %v397_v20  ;;  %389 = vmax.xlane.f32.xlu0 %v388_v21 }
 0x251   :  { %404 = vmax.xlane.f32.xlu1 %v403_v22  ;;  %395 = vmax.xlane.f32.xlu0 %v394_v23 }
 0x255   :  { %410 = vmax.xlane.f32.xlu1 %v409_v24  ;;  %401 = vmax.xlane.f32.xlu0 %v400_v29 }
 0x259   :  { %416 = vmax.xlane.f32.xlu1 %v415_v30  ;;  %407 = vmax.xlane.f32.xlu0 %v406_v35 }
 0x25d   :  { %422 = vmax.xlane.f32.xlu1 %v421_v36  ;;  %413 = vmax.xlane.f32.xlu0 %v412_v37 }
 0x261   :  { %428 = vmax.xlane.f32.xlu1 %v427_v42  ;;  %419 = vmax.xlane.f32.xlu0 %v418_v43 }
 0x265   :  { %434 = vmax.xlane.f32.xlu1 %v433_v48  ;;  %425 = vmax.xlane.f32.xlu0 %v424_v49 }
 0x269   :  { %440 = vmax.xlane.f32.xlu1 %v439_v50  ;;  %431 = vmax.xlane.f32.xlu0 %v430_v51 }
 0x26d   :  { %437 = vmax.xlane.f32.xlu0 %v436_v53 }
 0x2ba   :  { %v348_v54 = vpop.xlane.xlu1 %347 }
 0x2bb   :  { %v442_v55 = vsub.f32 %v1378_v25, %v348_v54 }
 0x2bd   :  { %v474_v59 = vmul.f32 1.442695, %v442_v55 }
 0x2be   :  { %v357_v60 = vpop.xlane.xlu1 %356  ;;  %v351_v61 = vpop.xlane.xlu0 %350 }
 0x2bf   :  { %1079 = vpow2.f32 %v474_v59  ;;  %v445_v6 = vsub.f32 %v1396_v38, %v357_v60  ;;  %v443_v7 = vsub.f32 %v1398_v39, %v351_v61 }
 0x2c1   :  { %v480_v12 = vmul.f32 1.442695, %v445_v6  ;;  %v476_v13 = vmul.f32 1.442695, %v443_v7 }
 0x2c2   :  { %v363_v14 = vpop.xlane.xlu1 %362  ;;  %v354_v15 = vpop.xlane.xlu0 %353 }
 0x2c3   :  { %1081 = vpow2.f32 %v480_v12  ;;  %v447_v16 = vsub.f32 %v1400_v40, %v363_v14  ;;  %v444_v17 = vsub.f32 %v1380_v26, %v354_v15 }
 0x2c4   :  { %1083 = vpow2.f32 %v476_v13 }
 0x2c5   :  { %v484_v18 = vmul.f32 1.442695, %v447_v16  ;;  %v478_v25 = vmul.f32 1.442695, %v444_v17 }
 0x2c6   :  { %v369_v19 = vpop.xlane.xlu1 %368  ;;  %v360_v20 = vpop.xlane.xlu0 %359 }
 0x2c7   :  { %1085 = vpow2.f32 %v484_v18  ;;  %v449_v21 = vsub.f32 %v1402_v41, %v369_v19  ;;  %v446_v38 = vsub.f32 %v1382_v27, %v360_v20 }
 0x2c8   :  { %1087 = vpow2.f32 %v478_v25 }
 0x2c9   :  { %v1513_v39 = vpop.eup %1079  ;;  %v488_v22 = vmul.f32 1.442695, %v449_v21  ;;  %v482_v23 = vmul.f32 1.442695, %v446_v38 }
 0x2ca   :  { %v375_v24 = vpop.xlane.xlu1 %374  ;;  %570 = vrot.lane.b32.xlu0 %v1513_v39, %s1233_s2  ;;  %v366_v26 = vpop.xlane.xlu0 %365 }
 0x2cb   :  { %1089 = vpow2.f32 %v488_v22  ;;  %v451_v40 = vsub.f32 %v1404_v44, %v375_v24  ;;  %v448_v29 = vsub.f32 %v1384_v28, %v366_v26 }
 0x2cc   :  { %1091 = vpow2.f32 %v482_v23 }
 0x2cd   :  { %v1519_v41 = vpop.eup %1081  ;;  %v492_v27 = vmul.f32 1.442695, %v451_v40  ;;  %v486_v30 = vmul.f32 1.442695, %v448_v29 }
 0x2ce   :  { %v1521_v35 = vpop.eup %1083  ;;  %v381_v36 = vpop.xlane.xlu1 %380  ;;  %576 = vrot.lane.b32.xlu0 %v1519_v41, %s1233_s2 }
 0x2cf   :  { %v372_v37 = vpop.xlane.xlu0 %371  ;;  %1093 = vpow2.f32 %v492_v27  ;;  %v453_v42 = vsub.f32 %v1406_v45, %v381_v36  ;;  %572 = vrot.lane.b32.xlu1 %v1521_v35, %s1233_s2 }
 0x2d0   :  { %v450_v28 = vsub.f32 %v1386_v31, %v372_v37  ;;  %1095 = vpow2.f32 %v486_v30 }
 0x2d1   :  { %v1529_v44 = vpop.eup %1085  ;;  %v496_v43 = vmul.f32 1.442695, %v453_v42 }
 0x2d2   :  { %v490_v48 = vmul.f32 1.442695, %v450_v28  ;;  %v1531_v49 = vpop.eup %1087  ;;  %v387_v50 = vpop.xlane.xlu1 %386  ;;  %580 = vrot.lane.b32.xlu0 %v1529_v44, %s1233_s2 }
 0x2d3   :  { %v378_v51 = vpop.xlane.xlu0 %377  ;;  %1097 = vpow2.f32 %v496_v43  ;;  %v455_v45 = vsub.f32 %v1408_v46, %v387_v50  ;;  %574 = vrot.lane.b32.xlu1 %v1531_v49, %s1233_s2 }
 0x2d4   :  { %v452_v31 = vsub.f32 %v1388_v32, %v378_v51  ;;  %1099 = vpow2.f32 %v490_v48 }
 0x2d5   :  { %v1539_v53 = vpop.eup %1089  ;;  %v500_v54 = vmul.f32 1.442695, %v455_v45 }
 0x2d6   :  { %v494_v55 = vmul.f32 1.442695, %v452_v31  ;;  %v1541_v59 = vpop.eup %1091  ;;  %v393_v60 = vpop.xlane.xlu1 %392  ;;  %584 = vrot.lane.b32.xlu0 %v1539_v53, %s1233_s2 }
 0x2d7   :  { %v384_v61 = vpop.xlane.xlu0 %383  ;;  %1101 = vpow2.f32 %v500_v54  ;;  %v457_v46 = vsub.f32 %v1410_v47, %v393_v60  ;;  %578 = vrot.lane.b32.xlu1 %v1541_v59, %s1233_s2 }
 0x2d8   :  { %v454_v32 = vsub.f32 %v1390_v33, %v384_v61  ;;  %1103 = vpow2.f32 %v494_v55 }
 0x2d9   :  { %v1549_v6 = vpop.eup %1093  ;;  %v504_v7 = vmul.f32 1.442695, %v457_v46 }
 0x2da   :  { %v498_v12 = vmul.f32 1.442695, %v454_v32  ;;  %v1551_v13 = vpop.eup %1095  ;;  %v399_v14 = vpop.xlane.xlu1 %398  ;;  %588 = vrot.lane.b32.xlu0 %v1549_v6, %s1233_s2 }
 0x2db   :  { %v390_v15 = vpop.xlane.xlu0 %389  ;;  %1105 = vpow2.f32 %v504_v7  ;;  %v459_v47 = vsub.f32 %v1416_v52, %v399_v14  ;;  %582 = vrot.lane.b32.xlu1 %v1551_v13, %s1233_s2 }
 0x2dc   :  { %v456_v33 = vsub.f32 %v1392_v34, %v390_v15  ;;  %1107 = vpow2.f32 %v498_v12 }
 0x2dd   :  { %v1559_v16 = vpop.eup %1097  ;;  %v508_v17 = vmul.f32 1.442695, %v459_v47 }
 0x2de   :  { %v502_v18 = vmul.f32 1.442695, %v456_v33  ;;  %v1561_v25 = vpop.eup %1099  ;;  %v405_v19 = vpop.xlane.xlu1 %404  ;;  %592 = vrot.lane.b32.xlu0 %v1559_v16, %s1233_s2 }
 0x2df   :  { %v396_v20 = vpop.xlane.xlu0 %395  ;;  %1109 = vpow2.f32 %v508_v17  ;;  %v461_v52 = vsub.f32 %v1432_v0, %v405_v19  ;;  %586 = vrot.lane.b32.xlu1 %v1561_v25, %s1233_s2 }
 0x2e0   :  { %v458_v34 = vsub.f32 %v1420_v56, %v396_v20  ;;  %1111 = vpow2.f32 %v502_v18 }
 0x2e1   :  { %v1569_v21 = vpop.eup %1101  ;;  %v512_v38 = vmul.f32 1.442695, %v461_v52 }
 0x2e2   :  { %v506_v22 = vmul.f32 1.442695, %v458_v34  ;;  %v1571_v23 = vpop.eup %1103  ;;  %v411_v24 = vpop.xlane.xlu1 %410  ;;  %596 = vrot.lane.b32.xlu0 %v1569_v21, %s1233_s2 }
 0x2e3   :  { %v402_v26 = vpop.xlane.xlu0 %401  ;;  %1113 = vpow2.f32 %v512_v38  ;;  %v463_v0 = vsub.f32 %v1422_v57, %v411_v24  ;;  %590 = vrot.lane.b32.xlu1 %v1571_v23, %s1233_s2 }
 0x2e4   :  { %v460_v56 = vsub.f32 %v1434_v1, %v402_v26  ;;  %1115 = vpow2.f32 %v506_v22 }
 0x2e5   :  { %v1579_v40 = vpop.eup %1105  ;;  %v516_v29 = vmul.f32 1.442695, %v463_v0 }
 0x2e6   :  { %v510_v27 = vmul.f32 1.442695, %v460_v56  ;;  %v1581_v30 = vpop.eup %1107  ;;  %v417_v36 = vpop.xlane.xlu1 %416  ;;  %600 = vrot.lane.b32.xlu0 %v1579_v40, %s1233_s2 }
 0x2e7   :  { %v408_v37 = vpop.xlane.xlu0 %407  ;;  %1117 = vpow2.f32 %v516_v29  ;;  %v465_v57 = vsub.f32 %v1436_v2, %v417_v36  ;;  %594 = vrot.lane.b32.xlu1 %v1581_v30, %s1233_s2 }
 0x2e8   :  { %v462_v1 = vsub.f32 %v1424_v58, %v408_v37  ;;  %1119 = vpow2.f32 %v510_v27 }
 0x2e9   :  { %v1589_v42 = vpop.eup %1109  ;;  %v520_v28 = vmul.f32 1.442695, %v465_v57 }
 0x2ea   :  { %v514_v43 = vmul.f32 1.442695, %v462_v1  ;;  %v1591_v48 = vpop.eup %1111  ;;  %v423_v50 = vpop.xlane.xlu1 %422  ;;  %604 = vrot.lane.b32.xlu0 %v1589_v42, %s1233_s2 }
 0x2eb   :  { %v414_v51 = vpop.xlane.xlu0 %413  ;;  %1121 = vpow2.f32 %v520_v28  ;;  %v467_v2 = vsub.f32 %v1428_v62, %v423_v50  ;;  %598 = vrot.lane.b32.xlu1 %v1591_v48, %s1233_s2 }
 0x2ec   :  { %v464_v58 = vsub.f32 %v1438_v3, %v414_v51  ;;  %1123 = vpow2.f32 %v514_v43 }
 0x2ed   :  { %v1599_v45 = vpop.eup %1113  ;;  %v524_v31 = vmul.f32 1.442695, %v467_v2 }
 0x2ee   :  { %v518_v54 = vmul.f32 1.442695, %v464_v58  ;;  %v1601_v55 = vpop.eup %1115  ;;  %v429_v60 = vpop.xlane.xlu1 %428  ;;  %608 = vrot.lane.b32.xlu0 %v1599_v45, %s1233_s2 }
 0x2ef   :  { %v420_v61 = vpop.xlane.xlu0 %419  ;;  %1125 = vpow2.f32 %v524_v31  ;;  %v469_v62 = vsub.f32 %v1440_v4, %v429_v60  ;;  %602 = vrot.lane.b32.xlu1 %v1601_v55, %s1233_s2 }
 0x2f0   :  { %v466_v3 = vsub.f32 %v1430_v63, %v420_v61  ;;  %1127 = vpow2.f32 %v518_v54 }
 0x2f1   :  { %v1609_v46 = vpop.eup %1117  ;;  %v528_v32 = vmul.f32 1.442695, %v469_v62 }
 0x2f2   :  { %v522_v7 = vmul.f32 1.442695, %v466_v3  ;;  %v1611_v12 = vpop.eup %1119  ;;  %v435_v14 = vpop.xlane.xlu1 %434  ;;  %612 = vrot.lane.b32.xlu0 %v1609_v46, %s1233_s2 }
 0x2f3   :  { %v426_v15 = vpop.xlane.xlu0 %425  ;;  %1129 = vpow2.f32 %v528_v32  ;;  %v471_v4 = vsub.f32 %v1442_v5, %v435_v14  ;;  %606 = vrot.lane.b32.xlu1 %v1611_v12, %s1233_s2 }
 0x2f4   :  { %v468_v63 = vsub.f32 %v1448_v8, %v426_v15  ;;  %1131 = vpow2.f32 %v522_v7 }
 0x2f5   :  { %v1619_v47 = vpop.eup %1121  ;;  %v532_v33 = vmul.f32 1.442695, %v471_v4 }
 0x2f6   :  { %v526_v17 = vmul.f32 1.442695, %v468_v63  ;;  %v1621_v18 = vpop.eup %1123  ;;  %v441_v19 = vpop.xlane.xlu1 %440  ;;  %616 = vrot.lane.b32.xlu0 %v1619_v47, %s1233_s2 }
 0x2f7   :  { %v432_v20 = vpop.xlane.xlu0 %431  ;;  %1133 = vpow2.f32 %v532_v33  ;;  %v473_v5 = vsub.f32 %v1450_v9, %v441_v19  ;;  %610 = vrot.lane.b32.xlu1 %v1621_v18, %s1233_s2 }
 0x2f8   :  { %v470_v8 = vsub.f32 %v1452_v10, %v432_v20  ;;  %1135 = vpow2.f32 %v526_v17 }
 0x2f9   :  { %v1629_v52 = vpop.eup %1125  ;;  %v536_v34 = vmul.f32 1.442695, %v473_v5 }
 0x2fa   :  { %v530_v38 = vmul.f32 1.442695, %v470_v8  ;;  %v1631_v22 = vpop.eup %1127  ;;  %620 = vrot.lane.b32.xlu0 %v1629_v52, %s1233_s2 }
 0x2fb   :  { %v438_v24 = vpop.xlane.xlu0 %437  ;;  %1137 = vpow2.f32 %v536_v34  ;;  %614 = vrot.lane.b32.xlu1 %v1631_v22, %s1233_s2 }
 0x2fc   :  { %v472_v9 = vsub.f32 %v1454_v11, %v438_v24  ;;  %1139 = vpow2.f32 %v530_v38 }
 0x2fd   :  { %v1638_v26 = vpop.eup %1129 }
 0x2fe   :  { %v534_v10 = vmul.f32 1.442695, %v472_v9  ;;  %v1640_v0 = vpop.eup %1131  ;;  %624 = vrot.lane.b32.xlu0 %v1638_v26, %s1233_s2 }
 0x2ff   :  { %618 = vrot.lane.b32.xlu1 %v1640_v0, %s1233_s2 }
 0x300   :  { %1141 = vpow2.f32 %v534_v10 }
 0x301   :  { %v1646_v56 = vpop.eup %1133 }
 0x302   :  { %v1648_v29 = vpop.eup %1135  ;;  %628 = vrot.lane.b32.xlu0 %v1646_v56, %s1233_s2 }
 0x303   :  { %622 = vrot.lane.b32.xlu1 %v1648_v29, %s1233_s2 }
 0x305   :  { %v1654_v11 = vpop.eup %1137 }
 0x306   :  { %v1656_v27 = vpop.eup %1139  ;;  %632 = vrot.lane.b32.xlu0 %v1654_v11, %s1233_s2 }
 0x307   :  { %626 = vrot.lane.b32.xlu1 %v1656_v27, %s1233_s2 }
 0x30a   :  { %v1662_v36 = vpop.eup %1141 }
 0x30b   :  { %630 = vrot.lane.b32.xlu1 %v1662_v36, %s1233_s2 }
 0x33c   :  { %v571_v37 = vpop.permute.xlu0 %570 }
 0x33d   :  { %v667_v57 = vsel %vm666_vm2, %v571_v37, 0.0 }
 0x33e   :  { %668 = vadd.xlane.f32.xlu1 %v667_v57 }
 0x340   :  { %v577_v1 = vpop.permute.xlu0 %576 }
 0x341   :  { %v573_v28 = vpop.permute.xlu1 %572  ;;  %v676_v43 = vsel %vm666_vm2, %v577_v1, 0.0 }
 0x342   :  { %v670_v50 = vsel %vm666_vm2, %v573_v28, 0.0  ;;  %677 = vadd.xlane.f32.xlu1 %v676_v43 }
 0x343   :  { %671 = vadd.xlane.f32.xlu0 %v670_v50 }
 0x344   :  { %v581_v51 = vpop.permute.xlu0 %580 }
 0x345   :  { %v575_v2 = vpop.permute.xlu1 %574  ;;  %v682_v58 = vsel %vm666_vm2, %v581_v51, 0.0 }
 0x346   :  { %v673_v31 = vsel %vm666_vm2, %v575_v2, 0.0  ;;  %683 = vadd.xlane.f32.xlu1 %v682_v58 }
 0x347   :  { %674 = vadd.xlane.f32.xlu0 %v673_v31 }
 0x348   :  { %v585_v54 = vpop.permute.xlu0 %584 }
 0x349   :  { %v579_v60 = vpop.permute.xlu1 %578  ;;  %v688_v61 = vsel %vm666_vm2, %v585_v54, 0.0 }
 0x34a   :  { %v679_v62 = vsel %vm666_vm2, %v579_v60, 0.0  ;;  %689 = vadd.xlane.f32.xlu1 %v688_v61 }
 0x34b   :  { %680 = vadd.xlane.f32.xlu0 %v679_v62 }
 0x34c   :  { %v589_v3 = vpop.permute.xlu0 %588 }
 0x34d   :  { %v583_v32 = vpop.permute.xlu1 %582  ;;  %v694_v7 = vsel %vm666_vm2, %v589_v3, 0.0 }
 0x34e   :  { %v685_v14 = vsel %vm666_vm2, %v583_v32, 0.0  ;;  %695 = vadd.xlane.f32.xlu1 %v694_v7 }
 0x34f   :  { %686 = vadd.xlane.f32.xlu0 %v685_v14 }
 0x350   :  { %v593_v15 = vpop.permute.xlu0 %592 }
 0x351   :  { %v587_v4 = vpop.permute.xlu1 %586  ;;  %v700_v63 = vsel %vm666_vm2, %v593_v15, 0.0 }
 0x352   :  { %v691_v33 = vsel %vm666_vm2, %v587_v4, 0.0  ;;  %701 = vadd.xlane.f32.xlu1 %v700_v63 }
 0x353   :  { %692 = vadd.xlane.f32.xlu0 %v691_v33 }
 0x354   :  { %v597_v17 = vpop.permute.xlu0 %596 }
 0x355   :  { %v591_v19 = vpop.permute.xlu1 %590  ;;  %v706_v20 = vsel %vm666_vm2, %v597_v17, 0.0 }
 0x356   :  { %v697_v5 = vsel %vm666_vm2, %v591_v19, 0.0  ;;  %707 = vadd.xlane.f32.xlu1 %v706_v20 }
 0x357   :  { %698 = vadd.xlane.f32.xlu0 %v697_v5 }
 0x358   :  { %v601_v8 = vpop.permute.xlu0 %600 }
 0x359   :  { %v595_v34 = vpop.permute.xlu1 %594  ;;  %v712_v38 = vsel %vm666_vm2, %v601_v8, 0.0 }
 0x35a   :  { %v703_v24 = vsel %vm666_vm2, %v595_v34, 0.0  ;;  %713 = vadd.xlane.f32.xlu1 %v712_v38 }
 0x35b   :  { %704 = vadd.xlane.f32.xlu0 %v703_v24 }
 0x35c   :  { %v605_v9 = vpop.permute.xlu0 %604 }
 0x35d   :  { %v599_v10 = vpop.permute.xlu1 %598  ;;  %v718_v37 = vsel %vm666_vm2, %v605_v9, 0.0 }
 0x35e   :  { %v709_v57 = vsel %vm666_vm2, %v599_v10, 0.0  ;;  %719 = vadd.xlane.f32.xlu1 %v718_v37 }
 0x35f   :  { %710 = vadd.xlane.f32.xlu0 %v709_v57 }
 0x360   :  { %v609_v1 = vpop.permute.xlu0 %608 }
 0x361   :  { %v603_v28 = vpop.permute.xlu1 %602  ;;  %v724_v43 = vsel %vm666_vm2, %v609_v1, 0.0 }
 0x362   :  { %v715_v50 = vsel %vm666_vm2, %v603_v28, 0.0  ;;  %725 = vadd.xlane.f32.xlu1 %v724_v43 }
 0x363   :  { %716 = vadd.xlane.f32.xlu0 %v715_v50 }
 0x364   :  { %v613_v51 = vpop.permute.xlu0 %612 }
 0x365   :  { %v607_v2 = vpop.permute.xlu1 %606  ;;  %v730_v58 = vsel %vm666_vm2, %v613_v51, 0.0 }
 0x366   :  { %v721_v31 = vsel %vm666_vm2, %v607_v2, 0.0  ;;  %731 = vadd.xlane.f32.xlu1 %v730_v58 }
 0x367   :  { %722 = vadd.xlane.f32.xlu0 %v721_v31 }
 0x368   :  { %v617_v54 = vpop.permute.xlu0 %616 }
 0x369   :  { %v611_v60 = vpop.permute.xlu1 %610  ;;  %v736_v61 = vsel %vm666_vm2, %v617_v54, 0.0 }
 0x36a   :  { %v727_v62 = vsel %vm666_vm2, %v611_v60, 0.0  ;;  %737 = vadd.xlane.f32.xlu1 %v736_v61 }
 0x36b   :  { %728 = vadd.xlane.f32.xlu0 %v727_v62 }
 0x36c   :  { %v621_v3 = vpop.permute.xlu0 %620 }
 0x36d   :  { %v615_v32 = vpop.permute.xlu1 %614  ;;  %v742_v7 = vsel %vm666_vm2, %v621_v3, 0.0 }
 0x36e   :  { %v733_v14 = vsel %vm666_vm2, %v615_v32, 0.0  ;;  %743 = vadd.xlane.f32.xlu1 %v742_v7 }
 0x36f   :  { %734 = vadd.xlane.f32.xlu0 %v733_v14 }
 0x370   :  { %v625_v15 = vpop.permute.xlu0 %624 }
 0x371   :  { %v619_v4 = vpop.permute.xlu1 %618  ;;  %v748_v63 = vsel %vm666_vm2, %v625_v15, 0.0 }
 0x372   :  { %v739_v33 = vsel %vm666_vm2, %v619_v4, 0.0  ;;  %749 = vadd.xlane.f32.xlu1 %v748_v63 }
 0x373   :  { %740 = vadd.xlane.f32.xlu0 %v739_v33 }
 0x374   :  { %v629_v17 = vpop.permute.xlu0 %628 }
 0x375   :  { %v623_v19 = vpop.permute.xlu1 %622  ;;  %v754_v20 = vsel %vm666_vm2, %v629_v17, 0.0 }
 0x376   :  { %v745_v5 = vsel %vm666_vm2, %v623_v19, 0.0  ;;  %755 = vadd.xlane.f32.xlu1 %v754_v20 }
 0x377   :  { %746 = vadd.xlane.f32.xlu0 %v745_v5 }
 0x378   :  { %v633_v8 = vpop.permute.xlu0 %632 }
 0x379   :  { %v627_v34 = vpop.permute.xlu1 %626  ;;  %v760_v38 = vsel %vm666_vm2, %v633_v8, 0.0 }
 0x37a   :  { %v751_v24 = vsel %vm666_vm2, %v627_v34, 0.0  ;;  %761 = vadd.xlane.f32.xlu1 %v760_v38 }
 0x37b   :  { %752 = vadd.xlane.f32.xlu0 %v751_v24 }
 0x37d   :  { %v631_v9 = vpop.permute.xlu1 %630 }
 0x37e   :  { %v757_v10 = vsel %vm666_vm2, %v631_v9, 0.0 }
 0x37f   :  { %758 = vadd.xlane.f32.xlu0 %v757_v10 }
 0x3cb   :  { %v669_v37 = vpop.xlane.xlu1 %668 }
 0x3cc   :  { %1143 = vrcp.f32 %v669_v37 }
 0x3cf   :  { %v678_v57 = vpop.xlane.xlu1 %677 }
 0x3d0   :  { %1145 = vrcp.f32 %v678_v57  ;;  %v672_v1 = vpop.xlane.xlu0 %671 }
 0x3d1   :  { %1147 = vrcp.f32 %v672_v1 }
 0x3d3   :  { %v684_v28 = vpop.xlane.xlu1 %683 }
 0x3d4   :  { %1149 = vrcp.f32 %v684_v28  ;;  %v675_v43 = vpop.xlane.xlu0 %674 }
 0x3d5   :  { %1151 = vrcp.f32 %v675_v43 }
 0x3d6   :  { %v1144_v50 = vpop.eup %1143 }
 0x3d7   :  { %v690_v51 = vpop.xlane.xlu1 %689  ;;  %v795_v2 = vmul.f32 %v1144_v50, %v1513_v39 }
 0x3d8   :  { %1153 = vrcp.f32 %v690_v51  ;;  %v681_v58 = vpop.xlane.xlu0 %680 }
 0x3d9   :  { %1155 = vrcp.f32 %v681_v58  ;;  %859 = vrot.lane.b32.xlu0 %v795_v2, %s1233_s2 }
 0x3da   :  { %v1146_v31 = vpop.eup %1145 }
 0x3db   :  { %v1148_v54 = vpop.eup %1147  ;;  %v696_v60 = vpop.xlane.xlu1 %695  ;;  %v798_v61 = vmul.f32 %v1146_v31, %v1519_v41 }
 0x3dc   :  { %1157 = vrcp.f32 %v696_v60  ;;  %v687_v62 = vpop.xlane.xlu0 %686  ;;  %v796_v3 = vmul.f32 %v1148_v54, %v1521_v35 }
 0x3dd   :  { %1159 = vrcp.f32 %v687_v62  ;;  %865 = vrot.lane.b32.xlu0 %v798_v61, %s1233_s2 }
 0x3de   :  { %v1150_v32 = vpop.eup %1149  ;;  %861 = vrot.lane.b32.xlu1 %v796_v3, %s1233_s2 }
 0x3df   :  { %v1152_v39 = vpop.eup %1151  ;;  %v702_v7 = vpop.xlane.xlu1 %701  ;;  %v800_v14 = vmul.f32 %v1150_v32, %v1529_v44 }
 0x3e0   :  { %1161 = vrcp.f32 %v702_v7  ;;  %v693_v15 = vpop.xlane.xlu0 %692  ;;  %v797_v4 = vmul.f32 %v1152_v39, %v1531_v49 }
 0x3e1   :  { %1163 = vrcp.f32 %v693_v15  ;;  %869 = vrot.lane.b32.xlu0 %v800_v14, %s1233_s2 }
 0x3e2   :  { %v1154_v41 = vpop.eup %1153  ;;  %863 = vrot.lane.b32.xlu1 %v797_v4, %s1233_s2 }
 0x3e3   :  { %v1156_v35 = vpop.eup %1155  ;;  %v708_v63 = vpop.xlane.xlu1 %707  ;;  %v802_v33 = vmul.f32 %v1154_v41, %v1539_v53 }
 0x3e4   :  { %1165 = vrcp.f32 %v708_v63  ;;  %v699_v17 = vpop.xlane.xlu0 %698  ;;  %v799_v19 = vmul.f32 %v1156_v35, %v1541_v59 }
 0x3e5   :  { %1167 = vrcp.f32 %v699_v17  ;;  %873 = vrot.lane.b32.xlu0 %v802_v33, %s1233_s2 }
 0x3e6   :  { %v1158_v44 = vpop.eup %1157  ;;  %867 = vrot.lane.b32.xlu1 %v799_v19, %s1233_s2 }
 0x3e7   :  { %v1160_v49 = vpop.eup %1159  ;;  %v714_v20 = vpop.xlane.xlu1 %713  ;;  %v804_v5 = vmul.f32 %v1158_v44, %v1549_v6 }
 0x3e8   :  { %1169 = vrcp.f32 %v714_v20  ;;  %v705_v8 = vpop.xlane.xlu0 %704  ;;  %v801_v34 = vmul.f32 %v1160_v49, %v1551_v13 }
 0x3e9   :  { %1171 = vrcp.f32 %v705_v8  ;;  %877 = vrot.lane.b32.xlu0 %v804_v5, %s1233_s2 }
 0x3ea   :  { %v1162_v53 = vpop.eup %1161  ;;  %871 = vrot.lane.b32.xlu1 %v801_v34, %s1233_s2 }
 0x3eb   :  { %v1164_v59 = vpop.eup %1163  ;;  %v720_v38 = vpop.xlane.xlu1 %719  ;;  %v806_v24 = vmul.f32 %v1162_v53, %v1559_v16 }
 0x3ec   :  { %1173 = vrcp.f32 %v720_v38  ;;  %v711_v9 = vpop.xlane.xlu0 %710  ;;  %v803_v10 = vmul.f32 %v1164_v59, %v1561_v25 }
 0x3ed   :  { %1175 = vrcp.f32 %v711_v9  ;;  %881 = vrot.lane.b32.xlu0 %v806_v24, %s1233_s2 }
 0x3ee   :  { %v1166_v6 = vpop.eup %1165  ;;  %875 = vrot.lane.b32.xlu1 %v803_v10, %s1233_s2 }
 0x3ef   :  { %v1168_v13 = vpop.eup %1167  ;;  %v726_v37 = vpop.xlane.xlu1 %725  ;;  %v808_v57 = vmul.f32 %v1166_v6, %v1569_v21 }
 0x3f0   :  { %1177 = vrcp.f32 %v726_v37  ;;  %v717_v1 = vpop.xlane.xlu0 %716  ;;  %v805_v28 = vmul.f32 %v1168_v13, %v1571_v23 }
 0x3f1   :  { %1179 = vrcp.f32 %v717_v1  ;;  %885 = vrot.lane.b32.xlu0 %v808_v57, %s1233_s2 }
 0x3f2   :  { %v1170_v16 = vpop.eup %1169  ;;  %879 = vrot.lane.b32.xlu1 %v805_v28, %s1233_s2 }
 0x3f3   :  { %v1172_v25 = vpop.eup %1171  ;;  %v732_v43 = vpop.xlane.xlu1 %731  ;;  %v810_v50 = vmul.f32 %v1170_v16, %v1579_v40 }
 0x3f4   :  { %1181 = vrcp.f32 %v732_v43  ;;  %v723_v51 = vpop.xlane.xlu0 %722  ;;  %v807_v2 = vmul.f32 %v1172_v25, %v1581_v30 }
 0x3f5   :  { %1183 = vrcp.f32 %v723_v51  ;;  %889 = vrot.lane.b32.xlu0 %v810_v50, %s1233_s2 }
 0x3f6   :  { %v1174_v21 = vpop.eup %1173  ;;  %883 = vrot.lane.b32.xlu1 %v807_v2, %s1233_s2 }
 0x3f7   :  { %v1176_v23 = vpop.eup %1175  ;;  %v738_v58 = vpop.xlane.xlu1 %737  ;;  %v812_v31 = vmul.f32 %v1174_v21, %v1589_v42 }
 0x3f8   :  { %1185 = vrcp.f32 %v738_v58  ;;  %v729_v54 = vpop.xlane.xlu0 %728  ;;  %v809_v60 = vmul.f32 %v1176_v23, %v1591_v48 }
 0x3f9   :  { %1187 = vrcp.f32 %v729_v54  ;;  %893 = vrot.lane.b32.xlu0 %v812_v31, %s1233_s2 }
 0x3fa   :  { %v1178_v40 = vpop.eup %1177  ;;  %887 = vrot.lane.b32.xlu1 %v809_v60, %s1233_s2 }
 0x3fb   :  { %v1180_v30 = vpop.eup %1179  ;;  %v744_v61 = vpop.xlane.xlu1 %743  ;;  %v814_v62 = vmul.f32 %v1178_v40, %v1599_v45 }
 0x3fc   :  { %1189 = vrcp.f32 %v744_v61  ;;  %v735_v3 = vpop.xlane.xlu0 %734  ;;  %v811_v32 = vmul.f32 %v1180_v30, %v1601_v55 }
 0x3fd   :  { %1191 = vrcp.f32 %v735_v3  ;;  %897 = vrot.lane.b32.xlu0 %v814_v62, %s1233_s2 }
 0x3fe   :  { %v1182_v42 = vpop.eup %1181  ;;  %891 = vrot.lane.b32.xlu1 %v811_v32, %s1233_s2 }
 0x3ff   :  { %v1184_v48 = vpop.eup %1183  ;;  %v750_v39 = vpop.xlane.xlu1 %749  ;;  %v816_v7 = vmul.f32 %v1182_v42, %v1609_v46 }
 0x400   :  { %1193 = vrcp.f32 %v750_v39  ;;  %v741_v14 = vpop.xlane.xlu0 %740  ;;  %v813_v15 = vmul.f32 %v1184_v48, %v1611_v12 }
 0x401   :  { %1195 = vrcp.f32 %v741_v14  ;;  %901 = vrot.lane.b32.xlu0 %v816_v7, %s1233_s2 }
 0x402   :  { %v1186_v45 = vpop.eup %1185  ;;  %895 = vrot.lane.b32.xlu1 %v813_v15, %s1233_s2 }
 0x403   :  { %v1188_v55 = vpop.eup %1187  ;;  %v756_v4 = vpop.xlane.xlu1 %755  ;;  %v818_v41 = vmul.f32 %v1186_v45, %v1619_v47 }
 0x404   :  { %1197 = vrcp.f32 %v756_v4  ;;  %v747_v35 = vpop.xlane.xlu0 %746  ;;  %v815_v63 = vmul.f32 %v1188_v55, %v1621_v18 }
 0x405   :  { %1199 = vrcp.f32 %v747_v35  ;;  %905 = vrot.lane.b32.xlu0 %v818_v41, %s1233_s2 }
 0x406   :  { %v1190_v46 = vpop.eup %1189  ;;  %899 = vrot.lane.b32.xlu1 %v815_v63, %s1233_s2 }
 0x407   :  { %v1192_v12 = vpop.eup %1191  ;;  %v762_v33 = vpop.xlane.xlu1 %761  ;;  %v820_v17 = vmul.f32 %v1190_v46, %v1629_v52 }
 0x408   :  { %1201 = vrcp.f32 %v762_v33  ;;  %v753_v19 = vpop.xlane.xlu0 %752  ;;  %v817_v44 = vmul.f32 %v1192_v12, %v1631_v22 }
 0x409   :  { %1203 = vrcp.f32 %v753_v19  ;;  %909 = vrot.lane.b32.xlu0 %v820_v17, %s1233_s2 }
 0x40a   :  { %v1194_v47 = vpop.eup %1193  ;;  %903 = vrot.lane.b32.xlu1 %v817_v44, %s1233_s2 }
 0x40b   :  { %v1196_v18 = vpop.eup %1195  ;;  %v822_v49 = vmul.f32 %v1194_v47, %v1638_v26 }
 0x40c   :  { %v759_v20 = vpop.xlane.xlu0 %758  ;;  %v819_v5 = vmul.f32 %v1196_v18, %v1640_v0 }
 0x40d   :  { %1205 = vrcp.f32 %v759_v20  ;;  %913 = vrot.lane.b32.xlu0 %v822_v49, %s1233_s2 }
 0x40e   :  { %v1198_v52 = vpop.eup %1197  ;;  %907 = vrot.lane.b32.xlu1 %v819_v5, %s1233_s2 }
 0x40f   :  { %v1200_v8 = vpop.eup %1199  ;;  %v824_v22 = vmul.f32 %v1198_v52, %v1646_v56 }
 0x410   :  { %v821_v34 = vmul.f32 %v1200_v8, %v1648_v29 }
 0x411   :  { %917 = vrot.lane.b32.xlu0 %v824_v22, %s1233_s2 }
 0x412   :  { %v1202_v53 = vpop.eup %1201  ;;  %911 = vrot.lane.b32.xlu1 %v821_v34, %s1233_s2 }
 0x413   :  { %v1204_v26 = vpop.eup %1203  ;;  %v826_v59 = vmul.f32 %v1202_v53, %v1654_v11 }
 0x414   :  { %v823_v0 = vmul.f32 %v1204_v26, %v1656_v27 }
 0x415   :  { %921 = vrot.lane.b32.xlu0 %v826_v59, %s1233_s2 }
 0x416   :  { %915 = vrot.lane.b32.xlu1 %v823_v0, %s1233_s2 }
 0x417   :  { %v1206_v38 = vpop.eup %1205 }
 0x418   :  { %v825_v24 = vmul.f32 %v1206_v38, %v1662_v36 }
 0x41a   :  { %919 = vrot.lane.b32.xlu1 %v825_v24, %s1233_s2 }
 0x44b   :  { %v860_v56 = vpop.permute.xlu0 %859 }
 0x44c   :  { %955 = vst.msk [vmem:[#allocation2] sm:$0xff] %vm666_vm2, %v860_v56 }
 0x44f   :  { %v866_v29 = vpop.permute.xlu0 %865 }
 0x450   :  { %v862_v9 = vpop.permute.xlu1 %861  ;;  %958 = vst.msk [vmem:[#allocation2 + $0x18] sm:$0xff] %vm666_vm2, %v866_v29 }
 0x451   :  { %956 = vst.msk [vmem:[#allocation2 + $0x8] sm:$0xff] %vm666_vm2, %v862_v9 }
 0x453   :  { %v870_v11 = vpop.permute.xlu0 %869 }
 0x454   :  { %v864_v27 = vpop.permute.xlu1 %863  ;;  %960 = vst.msk [vmem:[#allocation2 + $0x28] sm:$0xff] %vm666_vm2, %v870_v11 }
 0x455   :  { %957 = vst.msk [vmem:[#allocation2 + $0x10] sm:$0xff] %vm666_vm2, %v864_v27 }
 0x457   :  { %v874_v10 = vpop.permute.xlu0 %873 }
 0x458   :  { %v868_v6 = vpop.permute.xlu1 %867  ;;  %962 = vst.msk [vmem:[#allocation2 + $0x38] sm:$0xff] %vm666_vm2, %v874_v10 }
 0x459   :  { %959 = vst.msk [vmem:[#allocation2 + $0x20] sm:$0xff] %vm666_vm2, %v868_v6 }
 0x45b   :  { %v878_v36 = vpop.permute.xlu0 %877 }
 0x45c   :  { %v872_v13 = vpop.permute.xlu1 %871  ;;  %964 = vst.msk [vmem:[#allocation2 + $0x48] sm:$0xff] %vm666_vm2, %v878_v36 }
 0x45d   :  { %961 = vst.msk [vmem:[#allocation2 + $0x30] sm:$0xff] %vm666_vm2, %v872_v13 }
 0x45f   :  { %v882_v37 = vpop.permute.xlu0 %881 }
 0x460   :  { %v876_v57 = vpop.permute.xlu1 %875  ;;  %966 = vst.msk [vmem:[#allocation2 + $0x58] sm:$0xff] %vm666_vm2, %v882_v37 }
 0x461   :  { %963 = vst.msk [vmem:[#allocation2 + $0x40] sm:$0xff] %vm666_vm2, %v876_v57 }
 0x463   :  { %v886_v1 = vpop.permute.xlu0 %885 }
 0x464   :  { %v880_v28 = vpop.permute.xlu1 %879  ;;  %968 = vst.msk [vmem:[#allocation2 + $0x68] sm:$0xff] %vm666_vm2, %v886_v1 }
 0x465   :  { %965 = vst.msk [vmem:[#allocation2 + $0x50] sm:$0xff] %vm666_vm2, %v880_v28 }
 0x467   :  { %v890_v16 = vpop.permute.xlu0 %889 }
 0x468   :  { %v884_v25 = vpop.permute.xlu1 %883  ;;  %970 = vst.msk [vmem:[#allocation2 + $0x78] sm:$0xff] %vm666_vm2, %v890_v16 }
 0x469   :  { %967 = vst.msk [vmem:[#allocation2 + $0x60] sm:$0xff] %vm666_vm2, %v884_v25 }
 0x46b   :  { %v894_v43 = vpop.permute.xlu0 %893 }
 0x46c   :  { %v888_v50 = vpop.permute.xlu1 %887  ;;  %972 = vst.msk [vmem:[#allocation2 + $0x88] sm:$0xff] %vm666_vm2, %v894_v43 }
 0x46d   :  { %969 = vst.msk [vmem:[#allocation2 + $0x70] sm:$0xff] %vm666_vm2, %v888_v50 }
 0x46f   :  { %v898_v51 = vpop.permute.xlu0 %897 }
 0x470   :  { %v892_v2 = vpop.permute.xlu1 %891  ;;  %974 = vst.msk [vmem:[#allocation2 + $0x98] sm:$0xff] %vm666_vm2, %v898_v51 }
 0x471   :  { %971 = vst.msk [vmem:[#allocation2 + $0x80] sm:$0xff] %vm666_vm2, %v892_v2 }
 0x473   :  { %v902_v21 = vpop.permute.xlu0 %901 }
 0x474   :  { %v896_v23 = vpop.permute.xlu1 %895  ;;  %976 = vst.msk [vmem:[#allocation2 + $0xa8] sm:$0xff] %vm666_vm2, %v902_v21 }
 0x475   :  { %973 = vst.msk [vmem:[#allocation2 + $0x90] sm:$0xff] %vm666_vm2, %v896_v23 }
 0x477   :  { %v906_v58 = vpop.permute.xlu0 %905 }
 0x478   :  { %v900_v31 = vpop.permute.xlu1 %899  ;;  %978 = vst.msk [vmem:[#allocation2 + $0xb8] sm:$0xff] %vm666_vm2, %v906_v58 }
 0x479   :  { %975 = vst.msk [vmem:[#allocation2 + $0xa0] sm:$0xff] %vm666_vm2, %v900_v31 }
 0x47b   :  { %v910_v54 = vpop.permute.xlu0 %909 }
 0x47c   :  { %v904_v60 = vpop.permute.xlu1 %903  ;;  %980 = vst.msk [vmem:[#allocation2 + $0xc8] sm:$0xff] %vm666_vm2, %v910_v54 }
 0x47d   :  { %977 = vst.msk [vmem:[#allocation2 + $0xb0] sm:$0xff] %vm666_vm2, %v904_v60 }
 0x47f   :  { %v914_v40 = vpop.permute.xlu0 %913 }
 0x480   :  { %v908_v30 = vpop.permute.xlu1 %907  ;;  %982 = vst.msk [vmem:[#allocation2 + $0xd8] sm:$0xff] %vm666_vm2, %v914_v40 }
 0x481   :  { %979 = vst.msk [vmem:[#allocation2 + $0xc0] sm:$0xff] %vm666_vm2, %v908_v30 }
 0x483   :  { %v918_v61 = vpop.permute.xlu0 %917 }
 0x484   :  { %v912_v62 = vpop.permute.xlu1 %911  ;;  %984 = vst.msk [vmem:[#allocation2 + $0xe8] sm:$0xff] %vm666_vm2, %v918_v61 }
 0x485   :  { %981 = vst.msk [vmem:[#allocation2 + $0xd0] sm:$0xff] %vm666_vm2, %v912_v62 }
 0x487   :  { %v922_v3 = vpop.permute.xlu0 %921 }
 0x488   :  { %v916_v32 = vpop.permute.xlu1 %915  ;;  %986 = vst.msk [vmem:[#allocation2 + $0xf8] sm:$0xff] %vm666_vm2, %v922_v3 }
 0x489   :  { %983 = vst.msk [vmem:[#allocation2 + $0xe0] sm:$0xff] %vm666_vm2, %v916_v32 }
 0x48c   :  { %v920_v42 = vpop.permute.xlu1 %919 }
 0x48d   :  { %985 = vst.msk [vmem:[#allocation2 + $0xf0] sm:$0xff] %vm666_vm2, %v920_v42 }
 0x48e   :  { %1218 = shalt.err (!%p1215_p4)
}
 0x48f   :  { %s1219_s14 = scalar_lea.hbm %s1811_s5, 4096 }
 0x490   :  { %p1220_p5 = scmp.ne.s32.totalorder %s1811_s5, %s1219_s14  ;;  %p1223_p6 = scmp.lt.u32.totalorder %s1219_s14, %s1811_s5 }
 0x492   :  { %p1225_p7 = pnand %p1223_p6, %p1220_p5 }
 0x494   :  { %1228 = shalt.err (!%p1225_p7)
}
 0x495   :  { %s1235_s19 = smov 128   ;;  %s1236_s20 = smov 8  }
 0x496   :  { %998 = dma.vmem_to_hbm [thread:$0]  %s993_s4, 4096, %s1811_s5, [#allocation3], %s1235_s19, %s1235_s19, %s1236_s20  }
 0x497   :  { %1229 = dma.done.wait [#allocation3], 4096  }
 0x498   :  { %1230 = vsyncadd [#allocation3], 4294963200 }
 0x499   :  { %1002 = vsyncpa [#allocation3], 1 }

</bundles_post_ra>
